<compile_context>
chip_gen: v6e
topology: v6e:2x2x1
jax: 0.10.0
libtpu: 0.0.40
codegen_flags: <defaults>
</compile_context>

<pallas_src>
import functools

import jax
import jax.numpy as jnp
from jax import lax
from jax.experimental import pallas as pl
from jax.experimental.pallas import tpu as pltpu


def _convirt_kernel(v_ref, u_ref, loss_ref, *, temperature, lamda, n,
                    shared_col_exp):
    # torch.cosine_similarity clamps ||v||*||u|| at eps=1e-8; clamping each
    # norm at sqrt(eps)=1e-4 matches it exactly for non-degenerate rows.
    eps = 1e-8

    in_dtype = v_ref.dtype
    v = v_ref[...].astype(jnp.float32)   # (N, D)
    u = u_ref[...].astype(jnp.float32)   # (N, D)

    # Per-row inverse norms on the EUP instead of a K=1 matmul + NxN divide.
    v_sq = jnp.sum(v * v, axis=-1, keepdims=True)            # (N, 1)
    u_sq = jnp.sum(u * u, axis=-1, keepdims=True)            # (N, 1)
    v_inv = lax.rsqrt(jnp.maximum(v_sq, jnp.float32(eps)))   # 1/max(||v||, 1e-4)
    u_inv = lax.rsqrt(jnp.maximum(u_sq, jnp.float32(eps)))   # 1/max(||u||, 1e-4)

    inv_temp = jnp.float32(1.0 / temperature)
    v_hat = v * (v_inv * inv_temp)   # rows scaled by 1/(||v|| * temperature)
    u_hat = u * u_inv                # rows scaled by 1/||u||

    # MXU-native operands when the inputs are bf16; keep f32 otherwise so the
    # module's f32 semantics are preserved exactly.
    if in_dtype == jnp.bfloat16:
        v_mxu = v_hat.astype(jnp.bfloat16)
        u_mxu = u_hat.astype(jnp.bfloat16)
    else:
        v_mxu = v_hat
        u_mxu = u_hat

    # logits[i, j] = cos_sim(v_i, u_j) / temperature, straight from the MXU.
    logits = jnp.dot(v_mxu, u_mxu.T, preferred_element_type=jnp.float32)  # (N, N)

    # Diagonal directly from the paired rows (no NxN identity mask).
    diag = jnp.sum(v_hat * u_hat, axis=-1, keepdims=True)    # (N, 1)

    # Row-wise log-sum-exp (softmax over dim=1).
    row_max = jnp.max(logits, axis=1, keepdims=True)          # (N, 1)
    e_row = jnp.exp(logits - row_max)                         # (N, N)
    row_lse = jnp.log(jnp.sum(e_row, axis=1, keepdims=True)) + row_max

    # Column-wise log-sum-exp (softmax over dim=0 == log_softmax(logits.T)).
    col_max = jnp.max(logits, axis=0, keepdims=True)          # (1, N)
    if shared_col_exp:
        # exp(logits - col_max) == e_row * exp(row_max) * exp(-col_max).
        # Only 2N transcendentals instead of a second N^2 exp pass; safe
        # because |logits| <= 1/temperature (cosine in [-1, 1]) -- checked by
        # the wrapper before enabling this path.
        corr = jnp.exp(row_max) * jnp.exp(-col_max)           # (N, N) broadcast
        col_sum = jnp.sum(e_row * corr, axis=0, keepdims=True)
    else:
        col_sum = jnp.sum(jnp.exp(logits - col_max), axis=0, keepdims=True)
    col_lse = jnp.log(col_sum) + col_max                      # (1, N)

    # mean_i[ lamda*(row_lse_i - diag_i) + (1-lamda)*(col_lse_i - diag_i) ]
    #   == (lamda*sum(row_lse) + (1-lamda)*sum(col_lse) - sum(diag)) / N
    # -> three scalar reductions, no narrow-tile transposes.
    lam = jnp.float32(lamda)
    loss = (lam * jnp.sum(row_lse)
            + (jnp.float32(1.0) - lam) * jnp.sum(col_lse)
            - jnp.sum(diag)) / jnp.float32(n)
    loss_ref[0, 0] = loss


def convirt_contrastive_loss(image_v, text_u, temperature: float, lamda: float):
    n, d = image_v.shape
    assert text_u.shape == (n, d)

    # |logits| <= 1/temperature, so the shared-exp column pass is overflow-safe
    # iff exp(2/temperature) stays finite in f32 (with margin).
    shared_col_exp = (2.0 / float(temperature)) < 80.0

    kernel = functools.partial(
        _convirt_kernel,
        temperature=float(temperature),
        lamda=float(lamda),
        n=n,
        shared_col_exp=shared_col_exp,
    )

    # TODO(synk): for very large N (VMEM-bound on v7x's 64 MiB), switch to a
    # row/column-blocked grid with online row softmax + column accumulators.
    out = pl.pallas_call(
        kernel,
        out_shape=jax.ShapeDtypeStruct((1, 1), jnp.float32),
        in_specs=[
            pl.BlockSpec(memory_space=pltpu.MemorySpace.VMEM),
            pl.BlockSpec(memory_space=pltpu.MemorySpace.VMEM),
        ],
        out_specs=pl.BlockSpec(memory_space=pltpu.MemorySpace.SMEM),
        cost_estimate=pl.CostEstimate(
            flops=2 * n * n * d + 8 * n * d + 8 * n * n,
            transcendentals=(n * n + 4 * n) if shared_col_exp else (2 * n * n + 2 * n),
            bytes_accessed=2 * n * d * image_v.dtype.itemsize + 4,
        ),
    )(image_v, text_u)
    return out[0, 0]


def _reference_loss(image_v, text_u, temperature, lamda):
    """Pure-JAX reference mirroring the PyTorch module."""
    eps = 1e-8
    v = image_v.astype(jnp.float32)
    u = text_u.astype(jnp.float32)
    v_n = jnp.sqrt(jnp.sum(v * v, -1, keepdims=True))
    u_n = jnp.sqrt(jnp.sum(u * u, -1, keepdims=True))
    sim = (v @ u.T) / jnp.maximum(v_n @ u_n.T, eps)
    logits = sim / temperature
    l_vu = -jnp.diag(jax.nn.log_softmax(logits, axis=1))
    l_uv = -jnp.diag(jax.nn.log_softmax(logits.T, axis=1))
    return jnp.mean(lamda * l_vu + (1.0 - lamda) * l_uv)


if __name__ == "__main__":
    key = jax.random.PRNGKey(0)
    k1, k2 = jax.random.split(key)

    N, D = 8, 128          # batch of 8 pairs, 128-dim embeddings
    temperature = 0.1
    lamda = 0.75

    image_v = jax.random.normal(k1, (N, D), dtype=jnp.float32)
    text_u = jax.random.normal(k2, (N, D), dtype=jnp.float32)

    loss = convirt_contrastive_loss(image_v, text_u, temperature, lamda)
    loss = jax.block_until_ready(loss)

    ref = _reference_loss(image_v, text_u, temperature, lamda)
    assert jnp.allclose(loss, ref, atol=1e-4, rtol=1e-4), (loss, ref)

    print("KERNEL_OK")
</pallas_src>

<mosaic_0001>
module attributes {stable_mosaic.version = 11 : i64} {
  func.func @_convirt_kernel(%arg0: memref<8x128xf32, #tpu.memory_space<vmem>>, %arg1: memref<8x128xf32, #tpu.memory_space<vmem>>, %arg2: memref<1x1xf32, #tpu.memory_space<smem>>) attributes {dimension_semantics = [], scalar_prefetch = 0 : i64, scratch_operands = 0 : i64, tpu.core_type = #tpu.core_type<tc>} {
    %c0 = arith.constant 0 : index
    %c0_0 = arith.constant 0 : index
    %0 = vector.load %arg0[%c0, %c0_0] : memref<8x128xf32, #tpu.memory_space<vmem>>, vector<8x128xf32>
    %c0_1 = arith.constant 0 : index
    %c0_2 = arith.constant 0 : index
    %1 = vector.load %arg1[%c0_1, %c0_2] : memref<8x128xf32, #tpu.memory_space<vmem>>, vector<8x128xf32>
    %2 = arith.mulf %0, %0 : vector<8x128xf32>
    %cst = arith.constant dense<0.000000e+00> : vector<8xf32>
    %3 = vector.multi_reduction <add>, %2, %cst [1] : vector<8x128xf32> to vector<8xf32>
    %4 = vector.shape_cast %3 : vector<8xf32> to vector<8x1xf32>
    %5 = arith.mulf %1, %1 : vector<8x128xf32>
    %cst_3 = arith.constant dense<0.000000e+00> : vector<8xf32>
    %6 = vector.multi_reduction <add>, %5, %cst_3 [1] : vector<8x128xf32> to vector<8xf32>
    %7 = vector.shape_cast %6 : vector<8xf32> to vector<8x1xf32>
    %cst_4 = arith.constant 9.99999993E-9 : f32
    %8 = vector.broadcast %cst_4 : f32 to vector<8x1xf32>
    %9 = arith.maximumf %4, %8 : vector<8x1xf32>
    %10 = math.rsqrt %9 : vector<8x1xf32>
    %cst_5 = arith.constant 9.99999993E-9 : f32
    %11 = vector.broadcast %cst_5 : f32 to vector<8x1xf32>
    %12 = arith.maximumf %7, %11 : vector<8x1xf32>
    %13 = math.rsqrt %12 : vector<8x1xf32>
    %cst_6 = arith.constant 1.000000e+01 : f32
    %14 = vector.broadcast %cst_6 : f32 to vector<8x1xf32>
    %15 = arith.mulf %10, %14 : vector<8x1xf32>
    %16 = vector.broadcast %15 : vector<8x1xf32> to vector<8x128xf32>
    %17 = arith.mulf %0, %16 : vector<8x128xf32>
    %18 = vector.broadcast %13 : vector<8x1xf32> to vector<8x128xf32>
    %19 = arith.mulf %1, %18 : vector<8x128xf32>
    %20 = tpu.transpose %19, [1, 0] : vector<8x128xf32> -> vector<128x8xf32>
    %cst_7 = arith.constant dense<0.000000e+00> : vector<8x8xf32>
    %21 = tpu.matmul %17, %20, %cst_7 {dimension_numbers = #tpu.dot_dimension_numbers<[1], [0], [0], [1], [0, 0, 1, 1], [], []>} : vector<8x128xf32>, vector<128x8xf32>, vector<8x8xf32> -> vector<8x8xf32>
    %22 = arith.mulf %17, %19 : vector<8x128xf32>
    %cst_8 = arith.constant dense<0.000000e+00> : vector<8xf32>
    %23 = vector.multi_reduction <add>, %22, %cst_8 [1] : vector<8x128xf32> to vector<8xf32>
    %24 = vector.shape_cast %23 : vector<8xf32> to vector<8x1xf32>
    %cst_9 = arith.constant dense<0xFF800000> : vector<8xf32>
    %25 = vector.multi_reduction <maximumf>, %21, %cst_9 [1] : vector<8x8xf32> to vector<8xf32>
    %26 = vector.shape_cast %25 : vector<8xf32> to vector<8x1xf32>
    %27 = vector.broadcast %26 : vector<8x1xf32> to vector<8x8xf32>
    %28 = arith.subf %21, %27 : vector<8x8xf32>
    %29 = math.exp %28 : vector<8x8xf32>
    %cst_10 = arith.constant dense<0.000000e+00> : vector<8xf32>
    %30 = vector.multi_reduction <add>, %29, %cst_10 [1] : vector<8x8xf32> to vector<8xf32>
    %31 = vector.shape_cast %30 : vector<8xf32> to vector<8x1xf32>
    %32 = math.log %31 : vector<8x1xf32>
    %33 = arith.addf %32, %26 : vector<8x1xf32>
    %cst_11 = arith.constant dense<0xFF800000> : vector<8xf32>
    %34 = vector.multi_reduction <maximumf>, %21, %cst_11 [0] : vector<8x8xf32> to vector<8xf32>
    %35 = vector.shape_cast %34 : vector<8xf32> to vector<1x8xf32>
    %36 = math.exp %26 : vector<8x1xf32>
    %cst_12 = arith.constant 0.000000e+00 : f32
    %37 = vector.broadcast %cst_12 : f32 to vector<1x8xf32>
    %38 = arith.subf %37, %35 : vector<1x8xf32>
    %39 = math.exp %38 : vector<1x8xf32>
    %40 = vector.broadcast %36 : vector<8x1xf32> to vector<8x8xf32>
    %41 = vector.broadcast %39 : vector<1x8xf32> to vector<8x8xf32>
    %42 = arith.mulf %40, %41 : vector<8x8xf32>
    %43 = arith.mulf %29, %42 : vector<8x8xf32>
    %cst_13 = arith.constant dense<0.000000e+00> : vector<8xf32>
    %44 = vector.multi_reduction <add>, %43, %cst_13 [0] : vector<8x8xf32> to vector<8xf32>
    %45 = vector.shape_cast %44 : vector<8xf32> to vector<1x8xf32>
    %46 = math.log %45 : vector<1x8xf32>
    %47 = arith.addf %46, %35 : vector<1x8xf32>
    %48 = vector.shape_cast %33 : vector<8x1xf32> to vector<1x8x1xf32>
    %cst_14 = arith.constant dense<0.000000e+00> : vector<1xf32>
    %49 = vector.multi_reduction <add>, %48, %cst_14 [1, 2] : vector<1x8x1xf32> to vector<1xf32>
    %50 = vector.shape_cast %49 : vector<1xf32> to vector<1x1x1xf32>
    %51 = vector.extract %50[0, 0, 0] : f32 from vector<1x1x1xf32>
    %cst_15 = arith.constant 7.500000e-01 : f32
    %52 = arith.mulf %cst_15, %51 : f32
    %cst_16 = arith.constant 1.000000e+00 : f32
    %cst_17 = arith.constant 7.500000e-01 : f32
    %53 = arith.subf %cst_16, %cst_17 : f32
    %54 = vector.shape_cast %47 : vector<1x8xf32> to vector<1x1x8xf32>
    %cst_18 = arith.constant dense<0.000000e+00> : vector<1xf32>
    %55 = vector.multi_reduction <add>, %54, %cst_18 [1, 2] : vector<1x1x8xf32> to vector<1xf32>
    %56 = vector.shape_cast %55 : vector<1xf32> to vector<1x1x1xf32>
    %57 = vector.extract %56[0, 0, 0] : f32 from vector<1x1x1xf32>
    %58 = arith.mulf %53, %57 : f32
    %59 = arith.addf %52, %58 : f32
    %60 = vector.shape_cast %24 : vector<8x1xf32> to vector<1x8x1xf32>
    %cst_19 = arith.constant dense<0.000000e+00> : vector<1xf32>
    %61 = vector.multi_reduction <add>, %60, %cst_19 [1, 2] : vector<1x8x1xf32> to vector<1xf32>
    %62 = vector.shape_cast %61 : vector<1xf32> to vector<1x1x1xf32>
    %63 = vector.extract %62[0, 0, 0] : f32 from vector<1x1x1xf32>
    %64 = arith.subf %59, %63 : f32
    %cst_20 = arith.constant 8.000000e+00 : f32
    %65 = arith.divf %64, %cst_20 : f32
    %c0_21 = arith.constant 0 : index
    %c0_22 = arith.constant 0 : index
    %66 = memref.load %arg2[%c0_21, %c0_22] : memref<1x1xf32, #tpu.memory_space<smem>>
    memref.store %65, %arg2[%c0_21, %c0_22] : memref<1x1xf32, #tpu.memory_space<smem>>
    return
  }
}

</mosaic_0001>

<bundles_post_ra>
// kernel: tpu_custom_call.1
= control target key start
LH: loop header
LB: loop body
LE: loop exit
PB: predicated region body
PF: predicated region fallthrough
CT: control target
= control target key end

     0   :  { %7 = vsyncpa [#allocation3], 0  ;;  %s334_s0 = inlined_call_operand.hbm [shape: f32[8,128], index: 0, kind: input, shape index: {}]   ;;  %s335_s1 = inlined_call_operand.hbm [shape: f32[8,128], index: 1, kind: input, shape index: {}]   ;;  %s336_s2 = inlined_call_operand.hbm [shape: f32[1,1], index: 2, kind: output, shape index: {}]  }
   0x1   :  { %8 = vsyncpa [#allocation6], 0 }
   0x2   :  { %9 = vsyncpa [#allocation4], 0  ;;  %s302_s9 = smov [#allocation2]   ;;  %s303_s11 = smov [#allocation5]  }
   0x3   :  { %s16_s10 = sshll.u32 %s302_s9, 4  ;;  %s26_s12 = sshll.u32 %s303_s11, 4  ;;  %s17_s10 = int_to_ptr.vmem [resolvable:$true] %s16_s10  ;;  %s27_s12 = int_to_ptr.vmem [resolvable:$true] %s26_s12 }
   0x4   :  { %s256_s13 = scalar_lea.vmem %s17_s10, 128  ;;  %p261_p1 = scmp.lt.s32.totalorder %s17_s10, %s17_s10 }
   0x5   :  { %p257_p0 = scmp.ne.s32.totalorder %s17_s10, %s256_s13  ;;  %p262_p2 = scmp.lt.s32.totalorder %s256_s13, %s256_s13 }
   0x7   :  { %p263_p3 = por %p262_p2, %p261_p1 }
   0x9   :  { %p264_p4 = pnand %p263_p3, %p257_p0 }
   0xb   :  { %267 = shalt.err (!%p264_p4)
}
   0xc   :  { %19 = dma.hbm_to_vmem [thread:$0]  %s334_s0, 128, %s17_s10, [#allocation3]  }
   0xd   :  { %s276_s16 = scalar_lea.vmem %s27_s12, 128  ;;  %p281_p6 = scmp.lt.s32.totalorder %s27_s12, %s27_s12 }
   0xe   :  { %p277_p5 = scmp.ne.s32.totalorder %s27_s12, %s276_s16  ;;  %p282_p7 = scmp.lt.s32.totalorder %s276_s16, %s276_s16 }
  0x10   :  { %p283_p8 = por %p282_p7, %p281_p6 }
  0x12   :  { %p284_p9 = pnand %p283_p8, %p277_p5 }
  0x14   :  { %287 = shalt.err (!%p284_p9)
}
  0x15   :  { %29 = dma.hbm_to_vmem [thread:$0]  %s335_s1, 128, %s27_s12, [#allocation6]  }
  0x16   :  { %296 = dma.done.wait [#allocation3], 128  }
  0x17   :  { %297 = vsyncadd [#allocation3], 4294967168 }
  0x18   :  { %298 = dma.done.wait [#allocation6], 128  }
  0x19   :  { %299 = vsyncadd [#allocation6], 4294967168  ;;  %v37_v0 = vld [vmem:[#allocation5] sm:$0xff]  ;;  %v36_v1 = vld [vmem:[#allocation2] sm:$0xff]  ;;  %v304_v4 = vmov 0.0   ;;  %vm305_vm0 = vmmov 0  }
  0x1a   :  { %v41_v2 = vmul.f32 %v37_v0, %v37_v0  ;;  %v38_v3 = vmul.f32 %v36_v1, %v36_v1  ;;  %218 = vmatprep.subr.mxu0 %v304_v4  ;;  %220 = vmatprep.mubr.msk.f32.mxu0 %vm305_vm0, %v304_v4  ;;  %vm124_vm1 = vcmask 64512   ;;  %vm172_vm2 = vcmask 57344   ;;  %s306_s25 = smov [#allocation7]  }
  0x1b   :  { %vm160_vm3 = vcmask 7168  }
  0x1c   :  { %42 = vadd.xlane.f32.xlu0 %v41_v2 }
  0x20   :  { %39 = vadd.xlane.f32.xlu0 %v38_v3 }
  0xa5   :  { %v43_v5 = vpop.xlane.xlu0 %42 }
  0xa6   :  { %v46_v6 = vmax.f32 %v43_v5, 1e-08 }
  0xa8   :  { %234 = vrsqrt.f32 %v46_v6 }
  0xa9   :  { %v40_v7 = vpop.xlane.xlu0 %39 }
  0xaa   :  { %v44_v8 = vmax.f32 %v40_v7, 1e-08 }
  0xac   :  { %236 = vrsqrt.f32 %v44_v8 }
  0xb5   :  { %v235_v9 = vpop.eup %234 }
  0xb6   :  { %v50_v10 = vmul.f32 %v235_v9, %v37_v0 }
  0xb8   :  { %219 = vmatpush3.xpose.msra.mxu0 %v50_v10 }
  0xb9   :  { %v237_v11 = vpop.eup %236 }
  0xba   :  { %v48_v12 = vmul.f32 10.0, %v237_v11 }
  0xbc   :  { %v49_v13 = vmul.f32 %v48_v12, %v36_v1 }
  0xbe   :  { %221 = vmatmul.mubr.f32.vlgmr.msra.gmra.mxu0 %v49_v13  ;;  %v121_v14 = vmul.f32 %v50_v10, %v49_v13 }
  0xc0   :  { %122 = vadd.xlane.f32.xlu0 %v121_v14 }
 0x149   :  { %v123_v52 = vpop.xlane.xlu0 %122 }
 0x14a   :  { %v185_v53 = vsel %vm160_vm3, %v123_v52, 0.0 }
 0x17e   :  { %v117_v15 = vpop.f32.mrf.mxu0 }
 0x17f   :  { %v125_v16 = vsel %vm124_vm1, %v117_v15, -inf }
 0x180   :  { %126 = vmax.xlane.f32.xlu1 %v125_v16  ;;  %v222_v17 = vpop.f32.mrf.mxu0  ;;  %v137_v18 = vrot.slane %v125_v16, 4 }
 0x182   :  { %v138_v19 = vmax.f32 %v125_v16, %v137_v18 }
 0x184   :  { %v139_v20 = vrot.slane %v138_v19, 2 }
 0x186   :  { %v140_v21 = vmax.f32 %v138_v19, %v139_v20 }
 0x188   :  { %v141_v22 = vrot.slane %v140_v21, 1 }
 0x18a   :  { %v142_v23 = vmax.f32 %v140_v21, %v141_v22 }
 0x18c   :  { %v145_v24 = vsub.f32 0.0, %v142_v23 }
 0x18e   :  { %v146_v25 = vmul.f32 1.442695, %v145_v24 }
 0x190   :  { %238 = vpow2.f32 %v146_v25 }
 0x19d   :  { %v239_v30 = vpop.eup %238 }
 0x209   :  { %v127_v26 = vpop.xlane.xlu1 %126 }
 0x20a   :  { %v128_v27 = vsub.f32 %v117_v15, %v127_v26  ;;  %v143_v28 = vmul.f32 1.442695, %v127_v26 }
 0x20c   :  { %v129_v29 = vmul.f32 1.442695, %v128_v27  ;;  %240 = vpow2.f32 %v143_v28 }
 0x20e   :  { %242 = vpow2.f32 %v129_v29 }
 0x219   :  { %v241_v31 = vpop.eup %240 }
 0x21a   :  { %v148_v32 = vmul.f32 %v241_v31, %v239_v30 }
 0x21b   :  { %v243_v33 = vpop.eup %242 }
 0x21c   :  { %v131_v34 = vsel %vm124_vm1, %v243_v33, 0.0  ;;  %v149_v35 = vmul.f32 %v243_v33, %v148_v32 }
 0x21d   :  { %132 = vadd.xlane.f32.xlu1 %v131_v34 }
 0x21e   :  { %v150_v36 = vsel %vm124_vm1, %v149_v35, 0.0 }
 0x21f   :  { %v151_v37 = vrot.slane %v150_v36, 4 }
 0x221   :  { %v152_v38 = vadd.f32 %v151_v37, %v150_v36 }
 0x223   :  { %v153_v39 = vrot.slane %v152_v38, 2 }
 0x225   :  { %v154_v40 = vadd.f32 %v153_v39, %v152_v38 }
 0x227   :  { %v155_v41 = vrot.slane %v154_v40, 1 }
 0x229   :  { %v156_v42 = vadd.f32 %v155_v41, %v154_v40 }
 0x22b   :  { %244 = vlog2.f32 %v156_v42 }
 0x238   :  { %v245_v43 = vpop.eup %244 }
 0x239   :  { %v158_v44 = vmul.f32 0.6931472, %v245_v43 }
 0x23b   :  { %v159_v45 = vadd.f32 %v158_v44, %v142_v23 }
 0x23d   :  { %v173_v46 = vsel %vm172_vm2, %v159_v45, 0.0 }
 0x23e   :  { %174 = vadd.xlane.f32.xlu0 %v173_v46 }
 0x2a6   :  { %v133_v47 = vpop.xlane.xlu1 %132 }
 0x2a7   :  { %246 = vlog2.f32 %v133_v47 }
 0x2b4   :  { %v247_v48 = vpop.eup %246 }
 0x2b5   :  { %v135_v49 = vmul.f32 0.6931472, %v247_v48 }
 0x2b7   :  { %v136_v50 = vadd.f32 %v135_v49, %v127_v26 }
 0x2b9   :  { %v161_v51 = vsel %vm160_vm3, %v136_v50, 0.0 }
 0x2ba   :  { %162 = vadd.xlane.f32.xlu1 %v161_v51 }
 0x2be   :  { %186 = vadd.xlane.f32.xlu1 %v185_v53 }
 0x2c7   :  { %v175_v54 = vpop.xlane.xlu0 %174 }
 0x2c8   :  { %v176_v55 = vrot.slane %v175_v54, 4 }
 0x2ca   :  { %v177_v56 = vadd.f32 %v176_v55, %v175_v54 }
 0x2cc   :  { %v178_v57 = vrot.slane %v177_v56, 2 }
 0x2ce   :  { %v179_v61 = vadd.f32 %v178_v57, %v177_v56 }
 0x2d0   :  { %v180_v3 = vrot.slane %v179_v61, 1 }
 0x2d2   :  { %v181_v8 = vadd.f32 %v180_v3, %v179_v61 }
 0x343   :  { %v163_v58 = vpop.xlane.xlu1 %162 }
 0x344   :  { %v164_v59 = vrot.slane %v163_v58, 4 }
 0x346   :  { %v165_v60 = vadd.f32 %v164_v59, %v163_v58 }
 0x347   :  { %v187_v62 = vpop.xlane.xlu1 %186 }
 0x348   :  { %v166_v63 = vrot.slane %v165_v60, 2  ;;  %v188_v0 = vrot.slane %v187_v62, 4 }
 0x34a   :  { %v189_v1 = vadd.f32 %v188_v0, %v187_v62  ;;  %v167_v2 = vadd.f32 %v166_v63, %v165_v60 }
 0x34c   :  { %v190_v4 = vrot.slane %v189_v1, 2  ;;  %v168_v5 = vrot.slane %v167_v2, 1 }
 0x34e   :  { %v191_v6 = vadd.f32 %v190_v4, %v189_v1  ;;  %v169_v7 = vadd.f32 %v168_v5, %v167_v2 }
 0x350   :  { %223 = vpush %v169_v7  ;;  %v192_v9 = vrot.slane %v191_v6, 1 }
 0x351   :  { %225 = vpush %v181_v8 }
 0x352   :  { %v193_v10 = vadd.f32 %v192_v9, %v191_v6 }
 0x354   :  { %227 = vpush %v193_v10 }
 0x381   :  { %s224_s0 = spop %223 }
 0x382   :  { %s171_s1 = smul.f32 0.75, %s224_s0  ;;  %s226_s19 = spop %225 }
 0x383   :  { %s183_s20 = smul.f32 0.25, %s226_s19 }
 0x385   :  { %s184_s21 = sadd.f32 %s183_s20, %s171_s1  ;;  %s228_s22 = spop %227 }
 0x387   :  { %s195_s23 = ssub.f32 %s184_s21, %s228_s22 }
 0x389   :  { %s198_s24 = smul.f32 0.125, %s195_s23 }
 0x38b   :  { %200 = sst [smem:[#allocation7]] %s198_s24 }
 0x38c   :  { %208 = dma.smem_to_hbm %s306_s25, 16, %s336_s2, [#allocation4]  }
 0x38d   :  { %300 = dma.done.wait [#allocation4], 16  }
 0x38e   :  { %301 = vsyncadd [#allocation4], 4294967280 }
 0x38f   :  { %212 = sfence }
 0x390   :  { %213 = vsyncpa [#allocation3], 1 }
 0x391   :  { %214 = vsyncpa [#allocation6], 1 }
 0x392   :  { %215 = vsyncpa [#allocation4], 1 }

</bundles_post_ra>
